<compile_context>
chip_gen: v7x
topology: tpu7x:2x2x1
jax: 0.10.0
libtpu: 0.0.40
codegen_flags: <defaults>
</compile_context>

<pallas_src>
import numpy as np
import jax
import jax.numpy as jnp
from jax.experimental import pallas as pl
from jax.experimental.pallas import tpu as pltpu

# ----- logical (module) dims -----
EMBED_DIM = 32                 # CLIPModel embed_dim
HID = EMBED_DIM * 2            # projection head hidden width (64)
VOCAB = 50
BN_EPS = 1e-5
LN_EPS = 1e-5
L2_EPS = 1e-12
LOGIT_SCALE_MIN = float(np.log(1.0 / 100.0))
LOGIT_SCALE_MAX = float(np.log(100.0))

# ----- TPU-padded dims (lane multiple of 128, sublane multiple of 8) -----
EMBED_PAD = 128                # 32 -> 128 (zero padding, masked stats)
HID_PAD = 128                  # 64 -> 128 (zero-padded weights/params)
IMG_FEAT = 128                 # stand-in for resnet50 2048-d pooled feature
TXT_HIDDEN = 128               # stand-in for BERT 768-d hidden size
VOCAB_PAD = 128                # 50 -> 128
B_PAD = 8                      # sublane-aligned batch
IMG_FLAT = 4 * 16 * 16         # flattened NCHW image (C*H*W)

# ----- weight-slab row offsets (all blocks are 128 lanes wide, bf16) -----
R_IMG_BB = 0                               # (IMG_FLAT, IMG_FEAT)
R_TOK = R_IMG_BB + IMG_FLAT                # (VOCAB_PAD, TXT_HIDDEN)
R_TXT_BB = R_TOK + VOCAB_PAD               # (TXT_HIDDEN, TXT_HIDDEN)
R_IW1 = R_TXT_BB + TXT_HIDDEN              # (IMG_FEAT, HID_PAD)   BN folded
R_IW2 = R_IW1 + IMG_FEAT                   # (HID_PAD, EMBED_PAD)
R_TW1 = R_IW2 + HID_PAD                    # (TXT_HIDDEN, HID_PAD) BN folded
R_TW2 = R_TW1 + TXT_HIDDEN                 # (HID_PAD, EMBED_PAD)
W_ROWS = R_TW2 + HID_PAD                   # 1792

# ----- vector-slab row indices (f32, each row is (1,128)) -----
V_IMG_BB_B = 0
V_TXT_BB_B = 1
V_I_B1, V_I_B2, V_I_LN_G, V_I_LN_B = 2, 3, 4, 5
V_T_B1, V_T_B2, V_T_LN_G, V_T_LN_B = 6, 7, 8, 9
V_ROWS = 16

# ----- packed output layout: [img_n | txt_n | logits(+pad)] -----
OUT_IMG_OFF = 0
OUT_TXT_OFF = EMBED_PAD
OUT_LOGIT_OFF = 2 * EMBED_PAD
OUT_LANES = 3 * EMBED_PAD      # 384 (lane-dense multiple of 128)


# ----------------------------- fused Pallas kernel ---------------------------

def clip_fused_kernel(scale_ref, ids_ref, mask_ref, img_ref,
                      w_ref, v_ref, out_ref):
    f32 = jnp.float32
    bf16 = jnp.bfloat16

    def vrow(i):                       # (1, 128) f32 bias / LN vector
        return v_ref[i:i + 1, :]

    def wblk(r, n=128):                # (n, 128) bf16 weight block
        return w_ref[r:r + n, :]

    def proj_head(x, w1, b1, w2, b2, ln_g, ln_b):
        # Linear(+folded eval BatchNorm1d) -> ReLU -> Dropout(eval: identity)
        # -> Linear -> LayerNorm (over the first EMBED_DIM lanes only).
        h = jnp.dot(x.astype(bf16), w1, preferred_element_type=f32) + b1
        h = jnp.maximum(h, 0.0)
        y = jnp.dot(h.astype(bf16), w2, preferred_element_type=f32) + b2
        lane = jax.lax.broadcasted_iota(jnp.int32, y.shape, 1)
        valid = (lane < EMBED_DIM).astype(f32)
        mu = jnp.sum(y * valid, axis=-1, keepdims=True) * (1.0 / EMBED_DIM)
        d = (y - mu) * valid
        var = jnp.sum(d * d, axis=-1, keepdims=True) * (1.0 / EMBED_DIM)
        out = d * jax.lax.rsqrt(var + LN_EPS) * ln_g + ln_b
        return out * valid             # keep padded lanes exactly zero

    # ---- image branch ----
    # TODO(synk): pretrained torchvision ResNet50 trunk not reproduced; a
    # single linear projection of the flattened NCHW image stands in for it.
    img_bb = jnp.dot(img_ref[...], wblk(R_IMG_BB, IMG_FLAT),
                     preferred_element_type=f32) + vrow(V_IMG_BB_B)
    img_emb = proj_head(img_bb, wblk(R_IW1), vrow(V_I_B1),
                        wblk(R_IW2), vrow(V_I_B2),
                        vrow(V_I_LN_G), vrow(V_I_LN_B))

    # ---- text branch ----
    # TODO(synk): pretrained 12-layer BERT encoder not reproduced; a masked
    # mean of token embeddings + linear stands in for last_hidden_state[:,0,:].
    ids = ids_ref[...]                                 # (Bp, S) int32
    msk = mask_ref[...]                                # (Bp, S) f32
    S = ids.shape[1]
    vocab_iota = jax.lax.broadcasted_iota(jnp.int32, (B_PAD, VOCAB_PAD), 1)
    # masked token-count matrix, built with a balanced pairwise sum (no serial
    # accumulate chain); S is static so this fully unrolls.
    terms = [(ids[:, s:s + 1] == vocab_iota).astype(f32) * msk[:, s:s + 1]
             for s in range(S)]
    while len(terms) > 1:
        nxt = [terms[i] + terms[i + 1] for i in range(0, len(terms) - 1, 2)]
        if len(terms) % 2:
            nxt.append(terms[-1])
        terms = nxt
    weights = terms[0]                                 # (Bp, VOCAB_PAD)
    count = jnp.sum(msk, axis=1, keepdims=True)
    pooled = jnp.dot(weights.astype(bf16), wblk(R_TOK),
                     preferred_element_type=f32)
    pooled = pooled / jnp.maximum(count, 1.0)
    txt_bb = jnp.dot(pooled.astype(bf16), wblk(R_TXT_BB),
                     preferred_element_type=f32) + vrow(V_TXT_BB_B)
    txt_emb = proj_head(txt_bb, wblk(R_TW1), vrow(V_T_B1),
                        wblk(R_TW2), vrow(V_T_B2),
                        vrow(V_T_LN_G), vrow(V_T_LN_B))

    # ---- CLIP head: L2 normalise, clamp/exp logit scale, single logits tile ----
    img_n = img_emb * jax.lax.rsqrt(
        jnp.sum(img_emb * img_emb, axis=-1, keepdims=True) + L2_EPS)
    txt_n = txt_emb * jax.lax.rsqrt(
        jnp.sum(txt_emb * txt_emb, axis=-1, keepdims=True) + L2_EPS)
    scale = jnp.exp(jnp.clip(scale_ref[0, 0], LOGIT_SCALE_MIN, LOGIT_SCALE_MAX))
    dn = (((1,), (1,)), ((), ()))                      # A.B^T, no explicit transpose
    logits = scale * jax.lax.dot_general(img_n, txt_n, dn,
                                         preferred_element_type=f32)

    # ---- packed, mostly lane-dense output stores ----
    out_ref[:, OUT_IMG_OFF:OUT_IMG_OFF + EMBED_PAD] = img_n
    out_ref[:, OUT_TXT_OFF:OUT_TXT_OFF + EMBED_PAD] = txt_n
    out_ref[:, OUT_LOGIT_OFF:OUT_LANES] = jnp.zeros((B_PAD, EMBED_PAD), f32)
    out_ref[:, OUT_LOGIT_OFF:OUT_LOGIT_OFF + B_PAD] = logits


# ------------------------------ wrapper ---------------------------------------

def _vmem():
    return pl.BlockSpec(memory_space=pltpu.MemorySpace.VMEM)


def _smem():
    return pl.BlockSpec(memory_space=pltpu.MemorySpace.SMEM)


def clip_forward(params, images, input_ids, attention_mask):
    B = images.shape[0]
    assert B <= B_PAD
    pad_b = B_PAD - B

    x = images.reshape(B, -1)                               # NCHW flattened row-major
    assert x.shape[1] == IMG_FLAT
    # NOTE: bf16 cast of images/activations for the MXU -> ~1e-2/1e-3 relative
    # divergence from an f32 PyTorch reference is expected.
    x = jnp.pad(x, ((0, pad_b), (0, 0))).astype(jnp.bfloat16)
    ids = jnp.pad(input_ids.astype(jnp.int32), ((0, pad_b), (0, 0)))
    msk = jnp.pad(attention_mask.astype(jnp.float32), ((0, pad_b), (0, 0)))

    out = pl.pallas_call(
        clip_fused_kernel,
        out_shape=jax.ShapeDtypeStruct((B_PAD, OUT_LANES), jnp.float32),
        in_specs=[_smem()] + [_vmem()] * 5,
        out_specs=_vmem(),
    )(params["logit_scale"], ids, msk, x, params["w_slab"], params["v_slab"])

    image_features = out[:B, OUT_IMG_OFF:OUT_IMG_OFF + EMBED_DIM]
    text_features = out[:B, OUT_TXT_OFF:OUT_TXT_OFF + EMBED_DIM]
    logits_per_image = out[:B, OUT_LOGIT_OFF:OUT_LOGIT_OFF + B]
    logits_per_text = logits_per_image.T                    # exact transpose
    return logits_per_image, logits_per_text, image_features, text_features


# --------------------------- parameter init -----------------------------------

def _pad_cols(a, n):
    return jnp.pad(a, ((0, 0), (0, n - a.shape[1])))


def _pad_rows(a, n):
    return jnp.pad(a, ((0, n - a.shape[0]), (0, 0)))


def init_head(key, in_dim):
    """Projection-head params with eval-mode BatchNorm1d folded into Linear1."""
    k = jax.random.split(key, 4)
    f32 = jnp.float32
    w1 = jax.random.normal(k[0], (in_dim, HID), f32) / np.sqrt(in_dim)
    b1 = jax.random.normal(k[1], (1, HID), f32) * 0.01
    w2 = jax.random.normal(k[2], (HID, EMBED_DIM), f32) / np.sqrt(HID)
    b2 = jax.random.normal(k[3], (1, EMBED_DIM), f32) * 0.01
    # eval-mode BatchNorm1d (gamma=1, beta=0, mean=0, var=1) folded exactly:
    # y = ((x @ w1 + b1) - m) * g * rsqrt(v + eps) + beta
    bn_g = jnp.ones((1, HID), f32)
    bn_b = jnp.zeros((1, HID), f32)
    bn_m = jnp.zeros((1, HID), f32)
    bn_v = jnp.ones((1, HID), f32)
    s = bn_g * jax.lax.rsqrt(bn_v + BN_EPS)
    w1 = w1 * s
    b1 = (b1 - bn_m) * s + bn_b
    return dict(
        w1=_pad_cols(w1, HID_PAD),
        b1=_pad_cols(b1, HID_PAD),
        w2=_pad_cols(_pad_rows(w2, HID_PAD), EMBED_PAD),
        b2=_pad_cols(b2, EMBED_PAD),
        ln_g=_pad_cols(jnp.ones((1, EMBED_DIM), f32), EMBED_PAD),
        ln_b=jnp.zeros((1, EMBED_PAD), f32),
    )


def init_params(key):
    k = jax.random.split(key, 5)
    f32 = jnp.float32

    # Backbone stand-ins (see TODO(synk) notes in the kernel).
    img_bb_w = (jax.random.normal(k[0], (IMG_FLAT, IMG_FEAT), f32)
                / np.sqrt(IMG_FLAT))
    img_bb_b = jnp.zeros((1, IMG_FEAT), f32)
    tok_emb = jax.random.normal(k[1], (VOCAB, TXT_HIDDEN), f32) * 0.02
    txt_bb_w = (jax.random.normal(k[2], (TXT_HIDDEN, TXT_HIDDEN), f32)
                / np.sqrt(TXT_HIDDEN))
    txt_bb_b = jnp.zeros((1, TXT_HIDDEN), f32)

    ih = init_head(k[3], IMG_FEAT)
    th = init_head(k[4], TXT_HIDDEN)

    # Single stacked weight slab (one DMA): every block is 128 lanes wide.
    w_slab = jnp.concatenate(
        [img_bb_w, _pad_rows(tok_emb, VOCAB_PAD), txt_bb_w,
         ih["w1"], ih["w2"], th["w1"], th["w2"]],
        axis=0).astype(jnp.bfloat16)
    assert w_slab.shape == (W_ROWS, 128)

    # Single stacked bias / LayerNorm vector slab (one DMA).
    v_rows = [img_bb_b, txt_bb_b,
              ih["b1"], ih["b2"], ih["ln_g"], ih["ln_b"],
              th["b1"], th["b2"], th["ln_g"], th["ln_b"]]
    v_slab = jnp.concatenate(
        v_rows + [jnp.zeros((V_ROWS - len(v_rows), 128), f32)], axis=0)
    assert v_slab.shape == (V_ROWS, 128)

    return dict(
        w_slab=w_slab,
        v_slab=v_slab,
        logit_scale=jnp.full((1, 1), np.log(1.0 / 0.07), f32),
    )


# -------------------------------- main -----------------------------------------

if __name__ == "__main__":
    key = jax.random.PRNGKey(0)
    k_img, k_ids, k_params = jax.random.split(key, 3)

    B, C, H, W, S = 2, 4, 16, 16, 8
    images = jax.random.normal(k_img, (B, C, H, W), jnp.float32)        # NCHW
    input_ids = jax.random.randint(k_ids, (B, S), 0, VOCAB, jnp.int32)
    attention_mask = jnp.ones((B, S), jnp.int32).at[:, -2:].set(0)

    params = init_params(k_params)

    outs = jax.jit(clip_forward)(params, images, input_ids, attention_mask)
    outs = jax.block_until_ready(outs)

    logits_per_image, logits_per_text, image_features, text_features = outs
    assert logits_per_image.shape == (B, B)
    assert logits_per_text.shape == (B, B)
    assert image_features.shape == (B, EMBED_DIM)
    assert text_features.shape == (B, EMBED_DIM)
    # features must be unit-norm
    assert np.allclose(np.linalg.norm(np.asarray(image_features), axis=1), 1.0,
                       atol=1e-4)
    assert np.allclose(np.linalg.norm(np.asarray(text_features), axis=1), 1.0,
                       atol=1e-4)
    assert np.allclose(np.asarray(logits_per_text),
                       np.asarray(logits_per_image).T, atol=1e-5)

    print("KERNEL_OK")
</pallas_src>

<mosaic_0001>
module attributes {stable_mosaic.version = 11 : i64} {
  func.func @clip_fused_kernel(%arg0: memref<1x1xf32, #tpu.memory_space<smem>>, %arg1: memref<8x8xi32, #tpu.memory_space<vmem>>, %arg2: memref<8x8xf32, #tpu.memory_space<vmem>>, %arg3: memref<8x1024xbf16, #tpu.memory_space<vmem>>, %arg4: memref<1792x128xbf16, #tpu.memory_space<vmem>>, %arg5: memref<16x128xf32, #tpu.memory_space<vmem>>, %arg6: memref<8x384xf32, #tpu.memory_space<vmem>>) attributes {dimension_semantics = [], scalar_prefetch = 0 : i64, scratch_operands = 0 : i64, tpu.core_type = #tpu.core_type<tc>} {
    %c0 = arith.constant 0 : index
    %c0_0 = arith.constant 0 : index
    %0 = vector.load %arg3[%c0, %c0_0] : memref<8x1024xbf16, #tpu.memory_space<vmem>>, vector<8x1024xbf16>
    %c0_1 = arith.constant 0 : index
    %c0_2 = arith.constant 0 : index
    %1 = vector.load %arg4[%c0_1, %c0_2] : memref<1792x128xbf16, #tpu.memory_space<vmem>>, vector<1024x128xbf16>
    %cst = arith.constant dense<0.000000e+00> : vector<8x128xf32>
    %2 = tpu.matmul %0, %1, %cst {dimension_numbers = #tpu.dot_dimension_numbers<[1], [0], [0], [1], [0, 0, 1, 1], [], []>} : vector<8x1024xbf16>, vector<1024x128xbf16>, vector<8x128xf32> -> vector<8x128xf32>
    %c0_3 = arith.constant 0 : index
    %c0_4 = arith.constant 0 : index
    %3 = vector.load %arg5[%c0_3, %c0_4] : memref<16x128xf32, #tpu.memory_space<vmem>>, vector<1x128xf32>
    %4 = vector.broadcast %3 : vector<1x128xf32> to vector<8x128xf32>
    %5 = arith.addf %2, %4 : vector<8x128xf32>
    %c1280 = arith.constant 1280 : index
    %c0_5 = arith.constant 0 : index
    %6 = vector.load %arg4[%c1280, %c0_5] : memref<1792x128xbf16, #tpu.memory_space<vmem>>, vector<128x128xbf16>
    %c2 = arith.constant 2 : index
    %c0_6 = arith.constant 0 : index
    %7 = vector.load %arg5[%c2, %c0_6] : memref<16x128xf32, #tpu.memory_space<vmem>>, vector<1x128xf32>
    %c1408 = arith.constant 1408 : index
    %c0_7 = arith.constant 0 : index
    %8 = vector.load %arg4[%c1408, %c0_7] : memref<1792x128xbf16, #tpu.memory_space<vmem>>, vector<128x128xbf16>
    %c3 = arith.constant 3 : index
    %c0_8 = arith.constant 0 : index
    %9 = vector.load %arg5[%c3, %c0_8] : memref<16x128xf32, #tpu.memory_space<vmem>>, vector<1x128xf32>
    %c4 = arith.constant 4 : index
    %c0_9 = arith.constant 0 : index
    %10 = vector.load %arg5[%c4, %c0_9] : memref<16x128xf32, #tpu.memory_space<vmem>>, vector<1x128xf32>
    %c5 = arith.constant 5 : index
    %c0_10 = arith.constant 0 : index
    %11 = vector.load %arg5[%c5, %c0_10] : memref<16x128xf32, #tpu.memory_space<vmem>>, vector<1x128xf32>
    %12 = arith.truncf %5 : vector<8x128xf32> to vector<8x128xbf16>
    %cst_11 = arith.constant dense<0.000000e+00> : vector<8x128xf32>
    %13 = tpu.matmul %12, %6, %cst_11 {dimension_numbers = #tpu.dot_dimension_numbers<[1], [0], [0], [1], [0, 0, 1, 1], [], []>} : vector<8x128xbf16>, vector<128x128xbf16>, vector<8x128xf32> -> vector<8x128xf32>
    %14 = vector.broadcast %7 : vector<1x128xf32> to vector<8x128xf32>
    %15 = arith.addf %13, %14 : vector<8x128xf32>
    %cst_12 = arith.constant 0.000000e+00 : f32
    %16 = vector.broadcast %cst_12 : f32 to vector<8x128xf32>
    %17 = arith.maximumf %15, %16 : vector<8x128xf32>
    %18 = arith.truncf %17 : vector<8x128xf32> to vector<8x128xbf16>
    %cst_13 = arith.constant dense<0.000000e+00> : vector<8x128xf32>
    %19 = tpu.matmul %18, %8, %cst_13 {dimension_numbers = #tpu.dot_dimension_numbers<[1], [0], [0], [1], [0, 0, 1, 1], [], []>} : vector<8x128xbf16>, vector<128x128xbf16>, vector<8x128xf32> -> vector<8x128xf32>
    %20 = vector.broadcast %9 : vector<1x128xf32> to vector<8x128xf32>
    %21 = arith.addf %19, %20 : vector<8x128xf32>
    %22 = tpu.iota {dimensions = array<i32: 1>} : vector<8x128xi32>
    %c32_i32 = arith.constant 32 : i32
    %23 = vector.broadcast %c32_i32 : i32 to vector<8x128xi32>
    %24 = arith.cmpi slt, %22, %23 : vector<8x128xi32>
    %25 = arith.extui %24 : vector<8x128xi1> to vector<8x128xi32>
    %26 = arith.sitofp %25 : vector<8x128xi32> to vector<8x128xf32>
    %27 = arith.mulf %21, %26 : vector<8x128xf32>
    %cst_14 = arith.constant dense<0.000000e+00> : vector<8xf32>
    %28 = vector.multi_reduction <add>, %27, %cst_14 [1] : vector<8x128xf32> to vector<8xf32>
    %29 = vector.shape_cast %28 : vector<8xf32> to vector<8x1xf32>
    %cst_15 = arith.constant 3.125000e-02 : f32
    %30 = vector.broadcast %cst_15 : f32 to vector<8x1xf32>
    %31 = arith.mulf %29, %30 : vector<8x1xf32>
    %32 = vector.broadcast %31 : vector<8x1xf32> to vector<8x128xf32>
    %33 = arith.subf %21, %32 : vector<8x128xf32>
    %34 = arith.mulf %33, %26 : vector<8x128xf32>
    %35 = arith.mulf %34, %34 : vector<8x128xf32>
    %cst_16 = arith.constant dense<0.000000e+00> : vector<8xf32>
    %36 = vector.multi_reduction <add>, %35, %cst_16 [1] : vector<8x128xf32> to vector<8xf32>
    %37 = vector.shape_cast %36 : vector<8xf32> to vector<8x1xf32>
    %cst_17 = arith.constant 3.125000e-02 : f32
    %38 = vector.broadcast %cst_17 : f32 to vector<8x1xf32>
    %39 = arith.mulf %37, %38 : vector<8x1xf32>
    %cst_18 = arith.constant 9.99999974E-6 : f32
    %40 = vector.broadcast %cst_18 : f32 to vector<8x1xf32>
    %41 = arith.addf %39, %40 : vector<8x1xf32>
    %42 = math.rsqrt %41 : vector<8x1xf32>
    %43 = vector.broadcast %42 : vector<8x1xf32> to vector<8x128xf32>
    %44 = arith.mulf %34, %43 : vector<8x128xf32>
    %45 = vector.broadcast %10 : vector<1x128xf32> to vector<8x128xf32>
    %46 = arith.mulf %44, %45 : vector<8x128xf32>
    %47 = vector.broadcast %11 : vector<1x128xf32> to vector<8x128xf32>
    %48 = arith.addf %46, %47 : vector<8x128xf32>
    %49 = arith.mulf %48, %26 : vector<8x128xf32>
    %c0_19 = arith.constant 0 : index
    %c0_20 = arith.constant 0 : index
    %50 = vector.load %arg1[%c0_19, %c0_20] : memref<8x8xi32, #tpu.memory_space<vmem>>, vector<8x8xi32>
    %c0_21 = arith.constant 0 : index
    %c0_22 = arith.constant 0 : index
    %51 = vector.load %arg2[%c0_21, %c0_22] : memref<8x8xf32, #tpu.memory_space<vmem>>, vector<8x8xf32>
    %52 = tpu.iota {dimensions = array<i32: 1>} : vector<8x128xi32>
    %53 = vector.extract_strided_slice %50 {offsets = [0, 0], sizes = [8, 1], strides = [1, 1]} : vector<8x8xi32> to vector<8x1xi32>
    %54 = vector.broadcast %53 : vector<8x1xi32> to vector<8x128xi32>
    %55 = arith.cmpi eq, %54, %52 : vector<8x128xi32>
    %56 = arith.extui %55 : vector<8x128xi1> to vector<8x128xi32>
    %57 = arith.sitofp %56 : vector<8x128xi32> to vector<8x128xf32>
    %58 = vector.extract_strided_slice %51 {offsets = [0, 0], sizes = [8, 1], strides = [1, 1]} : vector<8x8xf32> to vector<8x1xf32>
    %59 = vector.broadcast %58 : vector<8x1xf32> to vector<8x128xf32>
    %60 = arith.mulf %57, %59 : vector<8x128xf32>
    %61 = vector.extract_strided_slice %50 {offsets = [0, 1], sizes = [8, 1], strides = [1, 1]} : vector<8x8xi32> to vector<8x1xi32>
    %62 = vector.broadcast %61 : vector<8x1xi32> to vector<8x128xi32>
    %63 = arith.cmpi eq, %62, %52 : vector<8x128xi32>
    %64 = arith.extui %63 : vector<8x128xi1> to vector<8x128xi32>
    %65 = arith.sitofp %64 : vector<8x128xi32> to vector<8x128xf32>
    %66 = vector.extract_strided_slice %51 {offsets = [0, 1], sizes = [8, 1], strides = [1, 1]} : vector<8x8xf32> to vector<8x1xf32>
    %67 = vector.broadcast %66 : vector<8x1xf32> to vector<8x128xf32>
    %68 = arith.mulf %65, %67 : vector<8x128xf32>
    %69 = vector.extract_strided_slice %50 {offsets = [0, 2], sizes = [8, 1], strides = [1, 1]} : vector<8x8xi32> to vector<8x1xi32>
    %70 = vector.broadcast %69 : vector<8x1xi32> to vector<8x128xi32>
    %71 = arith.cmpi eq, %70, %52 : vector<8x128xi32>
    %72 = arith.extui %71 : vector<8x128xi1> to vector<8x128xi32>
    %73 = arith.sitofp %72 : vector<8x128xi32> to vector<8x128xf32>
    %74 = vector.extract_strided_slice %51 {offsets = [0, 2], sizes = [8, 1], strides = [1, 1]} : vector<8x8xf32> to vector<8x1xf32>
    %75 = vector.broadcast %74 : vector<8x1xf32> to vector<8x128xf32>
    %76 = arith.mulf %73, %75 : vector<8x128xf32>
    %77 = vector.extract_strided_slice %50 {offsets = [0, 3], sizes = [8, 1], strides = [1, 1]} : vector<8x8xi32> to vector<8x1xi32>
    %78 = vector.broadcast %77 : vector<8x1xi32> to vector<8x128xi32>
    %79 = arith.cmpi eq, %78, %52 : vector<8x128xi32>
    %80 = arith.extui %79 : vector<8x128xi1> to vector<8x128xi32>
    %81 = arith.sitofp %80 : vector<8x128xi32> to vector<8x128xf32>
    %82 = vector.extract_strided_slice %51 {offsets = [0, 3], sizes = [8, 1], strides = [1, 1]} : vector<8x8xf32> to vector<8x1xf32>
    %83 = vector.broadcast %82 : vector<8x1xf32> to vector<8x128xf32>
    %84 = arith.mulf %81, %83 : vector<8x128xf32>
    %85 = vector.extract_strided_slice %50 {offsets = [0, 4], sizes = [8, 1], strides = [1, 1]} : vector<8x8xi32> to vector<8x1xi32>
    %86 = vector.broadcast %85 : vector<8x1xi32> to vector<8x128xi32>
    %87 = arith.cmpi eq, %86, %52 : vector<8x128xi32>
    %88 = arith.extui %87 : vector<8x128xi1> to vector<8x128xi32>
    %89 = arith.sitofp %88 : vector<8x128xi32> to vector<8x128xf32>
    %90 = vector.extract_strided_slice %51 {offsets = [0, 4], sizes = [8, 1], strides = [1, 1]} : vector<8x8xf32> to vector<8x1xf32>
    %91 = vector.broadcast %90 : vector<8x1xf32> to vector<8x128xf32>
    %92 = arith.mulf %89, %91 : vector<8x128xf32>
    %93 = vector.extract_strided_slice %50 {offsets = [0, 5], sizes = [8, 1], strides = [1, 1]} : vector<8x8xi32> to vector<8x1xi32>
    %94 = vector.broadcast %93 : vector<8x1xi32> to vector<8x128xi32>
    %95 = arith.cmpi eq, %94, %52 : vector<8x128xi32>
    %96 = arith.extui %95 : vector<8x128xi1> to vector<8x128xi32>
    %97 = arith.sitofp %96 : vector<8x128xi32> to vector<8x128xf32>
    %98 = vector.extract_strided_slice %51 {offsets = [0, 5], sizes = [8, 1], strides = [1, 1]} : vector<8x8xf32> to vector<8x1xf32>
    %99 = vector.broadcast %98 : vector<8x1xf32> to vector<8x128xf32>
    %100 = arith.mulf %97, %99 : vector<8x128xf32>
    %101 = vector.extract_strided_slice %50 {offsets = [0, 6], sizes = [8, 1], strides = [1, 1]} : vector<8x8xi32> to vector<8x1xi32>
    %102 = vector.broadcast %101 : vector<8x1xi32> to vector<8x128xi32>
    %103 = arith.cmpi eq, %102, %52 : vector<8x128xi32>
    %104 = arith.extui %103 : vector<8x128xi1> to vector<8x128xi32>
    %105 = arith.sitofp %104 : vector<8x128xi32> to vector<8x128xf32>
    %106 = vector.extract_strided_slice %51 {offsets = [0, 6], sizes = [8, 1], strides = [1, 1]} : vector<8x8xf32> to vector<8x1xf32>
    %107 = vector.broadcast %106 : vector<8x1xf32> to vector<8x128xf32>
    %108 = arith.mulf %105, %107 : vector<8x128xf32>
    %109 = vector.extract_strided_slice %50 {offsets = [0, 7], sizes = [8, 1], strides = [1, 1]} : vector<8x8xi32> to vector<8x1xi32>
    %110 = vector.broadcast %109 : vector<8x1xi32> to vector<8x128xi32>
    %111 = arith.cmpi eq, %110, %52 : vector<8x128xi32>
    %112 = arith.extui %111 : vector<8x128xi1> to vector<8x128xi32>
    %113 = arith.sitofp %112 : vector<8x128xi32> to vector<8x128xf32>
    %114 = vector.extract_strided_slice %51 {offsets = [0, 7], sizes = [8, 1], strides = [1, 1]} : vector<8x8xf32> to vector<8x1xf32>
    %115 = vector.broadcast %114 : vector<8x1xf32> to vector<8x128xf32>
    %116 = arith.mulf %113, %115 : vector<8x128xf32>
    %117 = arith.addf %60, %68 : vector<8x128xf32>
    %118 = arith.addf %76, %84 : vector<8x128xf32>
    %119 = arith.addf %92, %100 : vector<8x128xf32>
    %120 = arith.addf %108, %116 : vector<8x128xf32>
    %121 = arith.addf %117, %118 : vector<8x128xf32>
    %122 = arith.addf %119, %120 : vector<8x128xf32>
    %123 = arith.addf %121, %122 : vector<8x128xf32>
    %cst_23 = arith.constant dense<0.000000e+00> : vector<8xf32>
    %124 = vector.multi_reduction <add>, %51, %cst_23 [1] : vector<8x8xf32> to vector<8xf32>
    %125 = vector.shape_cast %124 : vector<8xf32> to vector<8x1xf32>
    %126 = arith.truncf %123 : vector<8x128xf32> to vector<8x128xbf16>
    %c1024 = arith.constant 1024 : index
    %c0_24 = arith.constant 0 : index
    %127 = vector.load %arg4[%c1024, %c0_24] : memref<1792x128xbf16, #tpu.memory_space<vmem>>, vector<128x128xbf16>
    %cst_25 = arith.constant dense<0.000000e+00> : vector<8x128xf32>
    %128 = tpu.matmul %126, %127, %cst_25 {dimension_numbers = #tpu.dot_dimension_numbers<[1], [0], [0], [1], [0, 0, 1, 1], [], []>} : vector<8x128xbf16>, vector<128x128xbf16>, vector<8x128xf32> -> vector<8x128xf32>
    %cst_26 = arith.constant 1.000000e+00 : f32
    %129 = vector.broadcast %cst_26 : f32 to vector<8x1xf32>
    %130 = arith.maximumf %125, %129 : vector<8x1xf32>
    %131 = vector.broadcast %130 : vector<8x1xf32> to vector<8x128xf32>
    %132 = arith.divf %128, %131 : vector<8x128xf32>
    %133 = arith.truncf %132 : vector<8x128xf32> to vector<8x128xbf16>
    %c1152 = arith.constant 1152 : index
    %c0_27 = arith.constant 0 : index
    %134 = vector.load %arg4[%c1152, %c0_27] : memref<1792x128xbf16, #tpu.memory_space<vmem>>, vector<128x128xbf16>
    %cst_28 = arith.constant dense<0.000000e+00> : vector<8x128xf32>
    %135 = tpu.matmul %133, %134, %cst_28 {dimension_numbers = #tpu.dot_dimension_numbers<[1], [0], [0], [1], [0, 0, 1, 1], [], []>} : vector<8x128xbf16>, vector<128x128xbf16>, vector<8x128xf32> -> vector<8x128xf32>
    %c1 = arith.constant 1 : index
    %c0_29 = arith.constant 0 : index
    %136 = vector.load %arg5[%c1, %c0_29] : memref<16x128xf32, #tpu.memory_space<vmem>>, vector<1x128xf32>
    %137 = vector.broadcast %136 : vector<1x128xf32> to vector<8x128xf32>
    %138 = arith.addf %135, %137 : vector<8x128xf32>
    %c1536 = arith.constant 1536 : index
    %c0_30 = arith.constant 0 : index
    %139 = vector.load %arg4[%c1536, %c0_30] : memref<1792x128xbf16, #tpu.memory_space<vmem>>, vector<128x128xbf16>
    %c6 = arith.constant 6 : index
    %c0_31 = arith.constant 0 : index
    %140 = vector.load %arg5[%c6, %c0_31] : memref<16x128xf32, #tpu.memory_space<vmem>>, vector<1x128xf32>
    %c1664 = arith.constant 1664 : index
    %c0_32 = arith.constant 0 : index
    %141 = vector.load %arg4[%c1664, %c0_32] : memref<1792x128xbf16, #tpu.memory_space<vmem>>, vector<128x128xbf16>
    %c7 = arith.constant 7 : index
    %c0_33 = arith.constant 0 : index
    %142 = vector.load %arg5[%c7, %c0_33] : memref<16x128xf32, #tpu.memory_space<vmem>>, vector<1x128xf32>
    %c8 = arith.constant 8 : index
    %c0_34 = arith.constant 0 : index
    %143 = vector.load %arg5[%c8, %c0_34] : memref<16x128xf32, #tpu.memory_space<vmem>>, vector<1x128xf32>
    %c9 = arith.constant 9 : index
    %c0_35 = arith.constant 0 : index
    %144 = vector.load %arg5[%c9, %c0_35] : memref<16x128xf32, #tpu.memory_space<vmem>>, vector<1x128xf32>
    %145 = arith.truncf %138 : vector<8x128xf32> to vector<8x128xbf16>
    %cst_36 = arith.constant dense<0.000000e+00> : vector<8x128xf32>
    %146 = tpu.matmul %145, %139, %cst_36 {dimension_numbers = #tpu.dot_dimension_numbers<[1], [0], [0], [1], [0, 0, 1, 1], [], []>} : vector<8x128xbf16>, vector<128x128xbf16>, vector<8x128xf32> -> vector<8x128xf32>
    %147 = vector.broadcast %140 : vector<1x128xf32> to vector<8x128xf32>
    %148 = arith.addf %146, %147 : vector<8x128xf32>
    %cst_37 = arith.constant 0.000000e+00 : f32
    %149 = vector.broadcast %cst_37 : f32 to vector<8x128xf32>
    %150 = arith.maximumf %148, %149 : vector<8x128xf32>
    %151 = arith.truncf %150 : vector<8x128xf32> to vector<8x128xbf16>
    %cst_38 = arith.constant dense<0.000000e+00> : vector<8x128xf32>
    %152 = tpu.matmul %151, %141, %cst_38 {dimension_numbers = #tpu.dot_dimension_numbers<[1], [0], [0], [1], [0, 0, 1, 1], [], []>} : vector<8x128xbf16>, vector<128x128xbf16>, vector<8x128xf32> -> vector<8x128xf32>
    %153 = vector.broadcast %142 : vector<1x128xf32> to vector<8x128xf32>
    %154 = arith.addf %152, %153 : vector<8x128xf32>
    %155 = tpu.iota {dimensions = array<i32: 1>} : vector<8x128xi32>
    %c32_i32_39 = arith.constant 32 : i32
    %156 = vector.broadcast %c32_i32_39 : i32 to vector<8x128xi32>
    %157 = arith.cmpi slt, %155, %156 : vector<8x128xi32>
    %158 = arith.extui %157 : vector<8x128xi1> to vector<8x128xi32>
    %159 = arith.sitofp %158 : vector<8x128xi32> to vector<8x128xf32>
    %160 = arith.mulf %154, %159 : vector<8x128xf32>
    %cst_40 = arith.constant dense<0.000000e+00> : vector<8xf32>
    %161 = vector.multi_reduction <add>, %160, %cst_40 [1] : vector<8x128xf32> to vector<8xf32>
    %162 = vector.shape_cast %161 : vector<8xf32> to vector<8x1xf32>
    %cst_41 = arith.constant 3.125000e-02 : f32
    %163 = vector.broadcast %cst_41 : f32 to vector<8x1xf32>
    %164 = arith.mulf %162, %163 : vector<8x1xf32>
    %165 = vector.broadcast %164 : vector<8x1xf32> to vector<8x128xf32>
    %166 = arith.subf %154, %165 : vector<8x128xf32>
    %167 = arith.mulf %166, %159 : vector<8x128xf32>
    %168 = arith.mulf %167, %167 : vector<8x128xf32>
    %cst_42 = arith.constant dense<0.000000e+00> : vector<8xf32>
    %169 = vector.multi_reduction <add>, %168, %cst_42 [1] : vector<8x128xf32> to vector<8xf32>
    %170 = vector.shape_cast %169 : vector<8xf32> to vector<8x1xf32>
    %cst_43 = arith.constant 3.125000e-02 : f32
    %171 = vector.broadcast %cst_43 : f32 to vector<8x1xf32>
    %172 = arith.mulf %170, %171 : vector<8x1xf32>
    %cst_44 = arith.constant 9.99999974E-6 : f32
    %173 = vector.broadcast %cst_44 : f32 to vector<8x1xf32>
    %174 = arith.addf %172, %173 : vector<8x1xf32>
    %175 = math.rsqrt %174 : vector<8x1xf32>
    %176 = vector.broadcast %175 : vector<8x1xf32> to vector<8x128xf32>
    %177 = arith.mulf %167, %176 : vector<8x128xf32>
    %178 = vector.broadcast %143 : vector<1x128xf32> to vector<8x128xf32>
    %179 = arith.mulf %177, %178 : vector<8x128xf32>
    %180 = vector.broadcast %144 : vector<1x128xf32> to vector<8x128xf32>
    %181 = arith.addf %179, %180 : vector<8x128xf32>
    %182 = arith.mulf %181, %159 : vector<8x128xf32>
    %183 = arith.mulf %49, %49 : vector<8x128xf32>
    %cst_45 = arith.constant dense<0.000000e+00> : vector<8xf32>
    %184 = vector.multi_reduction <add>, %183, %cst_45 [1] : vector<8x128xf32> to vector<8xf32>
    %185 = vector.shape_cast %184 : vector<8xf32> to vector<8x1xf32>
    %cst_46 = arith.constant 9.99999996E-13 : f32
    %186 = vector.broadcast %cst_46 : f32 to vector<8x1xf32>
    %187 = arith.addf %185, %186 : vector<8x1xf32>
    %188 = math.rsqrt %187 : vector<8x1xf32>
    %189 = vector.broadcast %188 : vector<8x1xf32> to vector<8x128xf32>
    %190 = arith.mulf %49, %189 : vector<8x128xf32>
    %191 = arith.mulf %182, %182 : vector<8x128xf32>
    %cst_47 = arith.constant dense<0.000000e+00> : vector<8xf32>
    %192 = vector.multi_reduction <add>, %191, %cst_47 [1] : vector<8x128xf32> to vector<8xf32>
    %193 = vector.shape_cast %192 : vector<8xf32> to vector<8x1xf32>
    %cst_48 = arith.constant 9.99999996E-13 : f32
    %194 = vector.broadcast %cst_48 : f32 to vector<8x1xf32>
    %195 = arith.addf %193, %194 : vector<8x1xf32>
    %196 = math.rsqrt %195 : vector<8x1xf32>
    %197 = vector.broadcast %196 : vector<8x1xf32> to vector<8x128xf32>
    %198 = arith.mulf %182, %197 : vector<8x128xf32>
    %c0_49 = arith.constant 0 : index
    %c0_50 = arith.constant 0 : index
    %199 = memref.load %arg0[%c0_49, %c0_50] : memref<1x1xf32, #tpu.memory_space<smem>>
    %cst_51 = arith.constant -4.60517025 : f32
    %cst_52 = arith.constant 4.60517025 : f32
    %200 = arith.maximumf %cst_51, %199 : f32
    %201 = arith.minimumf %cst_52, %200 : f32
    %202 = math.exp %201 : f32
    %cst_53 = arith.constant dense<0.000000e+00> : vector<8x8xf32>
    %203 = tpu.matmul %190, %198, %cst_53 {dimension_numbers = #tpu.dot_dimension_numbers<[1], [1], [0], [0], [0, 0, 1, 0], [], []>} : vector<8x128xf32>, vector<8x128xf32>, vector<8x8xf32> -> vector<8x8xf32>
    %204 = vector.broadcast %202 : f32 to vector<8x8xf32>
    %205 = arith.mulf %204, %203 : vector<8x8xf32>
    %c0_54 = arith.constant 0 : index
    %c0_55 = arith.constant 0 : index
    %206 = vector.load %arg6[%c0_54, %c0_55] : memref<8x384xf32, #tpu.memory_space<vmem>>, vector<8x128xf32>
    tpu.vector_store %arg6[%c0_54, %c0_55], %190 {strides = array<i32>} : memref<8x384xf32, #tpu.memory_space<vmem>>, vector<8x128xf32>,
    %c0_56 = arith.constant 0 : index
    %c128 = arith.constant 128 : index
    %207 = vector.load %arg6[%c0_56, %c128] : memref<8x384xf32, #tpu.memory_space<vmem>>, vector<8x128xf32>
    tpu.vector_store %arg6[%c0_56, %c128], %198 {strides = array<i32>} : memref<8x384xf32, #tpu.memory_space<vmem>>, vector<8x128xf32>,
    %cst_57 = arith.constant 0.000000e+00 : f32
    %208 = vector.broadcast %cst_57 : f32 to vector<8x128xf32>
    %c0_58 = arith.constant 0 : index
    %c256 = arith.constant 256 : index
    %209 = vector.load %arg6[%c0_58, %c256] : memref<8x384xf32, #tpu.memory_space<vmem>>, vector<8x128xf32>
    tpu.vector_store %arg6[%c0_58, %c256], %208 {strides = array<i32>} : memref<8x384xf32, #tpu.memory_space<vmem>>, vector<8x128xf32>,
    %c0_59 = arith.constant 0 : index
    %c256_60 = arith.constant 256 : index
    %210 = vector.load %arg6[%c0_59, %c256_60] : memref<8x384xf32, #tpu.memory_space<vmem>>, vector<8x8xf32>
    tpu.vector_store %arg6[%c0_59, %c256_60], %205 {strides = array<i32>} : memref<8x384xf32, #tpu.memory_space<vmem>>, vector<8x8xf32>,
    return
  }
}

</mosaic_0001>

<bundles_post_ra>
// kernel: clip_forward.1
= control target key start
LH: loop header
LB: loop body
LE: loop exit
PB: predicated region body
PF: predicated region fallthrough
CT: control target
= control target key end

     0   :  { %12 = vsyncpa [#allocation4], 0  ;;  %s2264_s21 = smov [#allocation3]   ;;  %s2485_s0 = inlined_call_operand.<no memory space> [shape: f32[1,1], index: 0, kind: input, shape index: {}]   ;;  %s2486_s1 = inlined_call_operand.vmem [shape: s32[8,8], index: 1, kind: input, shape index: {}]   ;;  %s2487_s2 = inlined_call_operand.vmem [shape: f32[8,8], index: 2, kind: input, shape index: {}]   ;;  %s2488_s3 = inlined_call_operand.vmem [shape: bf16[8,1024], index: 3, kind: input, shape index: {}]   ;;  %s2489_s4 = inlined_call_operand.hbm [shape: bf16[1792,128], index: 4, kind: input, shape index: {}]   ;;  %s2490_s5 = inlined_call_operand.vmem [shape: f32[16,128], index: 5, kind: input, shape index: {}]   ;;  %s2491_s6 = inlined_call_operand.vmem [shape: f32[8,384], index: 6, kind: output, shape index: {}]  }
   0x1   :  { %s26_s22 = sshll.u32 %s2264_s21, 4  ;;  %s2240_s25 = scalar_lea.hbm %s2489_s4, 14336  ;;  %s27_s22 = int_to_ptr.vmem [resolvable:$true] %s26_s22 }
   0x2   :  { %p2241_p0 = scmp.ne.s32.totalorder %s2489_s4, %s2240_s25  ;;  %p2244_p1 = scmp.lt.u32.totalorder %s2240_s25, %s2489_s4 }
   0x4   :  { %p2246_p2 = pnand %p2244_p1, %p2241_p0 }
   0x6   :  { %2249 = shalt.err (!%p2246_p2)
}
   0x7   :  { %s2250_s30 = scalar_lea.vmem %s27_s22, 14336  ;;  %p2255_p4 = scmp.lt.s32.totalorder %s27_s22, %s27_s22 }
   0x8   :  { %p2251_p3 = scmp.ne.s32.totalorder %s27_s22, %s2250_s30  ;;  %p2256_p5 = scmp.lt.s32.totalorder %s2250_s30, %s2250_s30 }
   0xa   :  { %p2257_p6 = por %p2256_p5, %p2255_p4 }
   0xc   :  { %p2258_p7 = pnand %p2257_p6, %p2251_p3 }
   0xe   :  { %2261 = shalt.err (!%p2258_p7)
}
   0xf   :  { %s2265_s7 = smov 64   ;;  %s2266_s8 = smov 4  }
  0x10   :  { %32 = dma.hbm_to_vmem [thread:$0]  %s2489_s4, 14336, %s27_s22, [#allocation4], %s2265_s7, %s2265_s7, %s2266_s8  }
  0x11   :  { %2262 = dma.done.wait [#allocation4], 14336  }
  0x12   :  { %2263 = vsyncadd [#allocation4], 4294952960  ;;  %v2267_v0 = vmov 2   ;;  %v2268_v1 = vmov 1   ;;  %v2108_v2 = vld [vmem:[#allocation3 + $0x40] sm:$0xff]   ;;  %v2112_v6 = vld [vmem:[#allocation3 + $0x48] sm:$0xff]  }
  0x13   :  { %2093 = vset.pattern.permute.xlu1 %v2267_v0  ;;  %2092 = vset.pattern.permute.xlu0 %v2268_v1  ;;  %v2109_v3 = vld [vmem:[#allocation3 + $0xc0] sm:$0xff]   ;;  %v2113_v7 = vld [vmem:[#allocation3 + $0xc8] sm:$0xff]   ;;  %v2116_v10 = vld [vmem:[#allocation3 + $0x50] sm:$0xff]   ;;  %vm2276_vm0 = vmmov 0   ;;  %vm1098_vm1 = vcmask 64512  }
  0x14   :  { %1806 = vmatprep.subr.bf16.mxu0 %v2108_v2  ;;  %v2110_v4 = vld [vmem:[#allocation3] sm:$0xff]   ;;  %1828 = vmatprep.subr.bf16.mxu1 %v2109_v3  ;;  %v2114_v8 = vld [vmem:[#allocation3 + $0x8] sm:$0xff]   ;;  %v2117_v11 = vld [vmem:[#allocation3 + $0xd0] sm:$0xff]   ;;  %s2277_s16 = smov -4.6051702  }
  0x15   :  { %v2111_v5 = vld [vmem:[#allocation3 + $0x80] sm:$0xff]   ;;  %1807 = vmatpush3.bf16.msra.mxu0 %v2110_v4  ;;  %v2115_v9 = vld [vmem:[#allocation3 + $0x88] sm:$0xff]   ;;  %v2118_v12 = vld [vmem:[#allocation3 + $0x10] sm:$0xff]   ;;  %s1580_s19 = smax.f32 %s2277_s16, %s2485_s0 }
  0x16   :  { %1829 = vmatpush3.bf16.msra.mxu1 %v2111_v5  ;;  %1808 = vmatprep.subr.bf16.mxu0 %v2112_v6  ;;  %v2119_v13 = vld [vmem:[#allocation3 + $0x90] sm:$0xff]   ;;  %v2120_v14 = vld [vmem:[#allocation3 + $0x58] sm:$0xff]   ;;  %v2124_v18 = vld [vmem:[#allocation3 + $0x60] sm:$0xff]  }
  0x17   :  { %1830 = vmatprep.subr.bf16.mxu1 %v2113_v7  ;;  %v2121_v15 = vld [vmem:[#allocation3 + $0xd8] sm:$0xff]   ;;  %v2125_v19 = vld [vmem:[#allocation3 + $0xe0] sm:$0xff]   ;;  %v2128_v22 = vld [vmem:[#allocation3 + $0x68] sm:$0xff]  }
  0x18   :  { %v2122_v16 = vld [vmem:[#allocation3 + $0x18] sm:$0xff]   ;;  %v2126_v20 = vld [vmem:[#allocation3 + $0x20] sm:$0xff]   ;;  %v2129_v23 = vld [vmem:[#allocation3 + $0xe8] sm:$0xff]  }
  0x19   :  { %1809 = vmatpush3.bf16.msra.mxu0 %v2114_v8  ;;  %v2123_v17 = vld [vmem:[#allocation3 + $0x98] sm:$0xff]   ;;  %v2127_v21 = vld [vmem:[#allocation3 + $0xa0] sm:$0xff]   ;;  %v2130_v24 = vld [vmem:[#allocation3 + $0x28] sm:$0xff]  }
  0x1a   :  { %1831 = vmatpush3.bf16.msra.mxu1 %v2115_v9  ;;  %1810 = vmatprep.subr.bf16.mxu0 %v2116_v10  ;;  %v2131_v25 = vld [vmem:[#allocation3 + $0xa8] sm:$0xff]   ;;  %v2132_v26 = vld [vmem:[#allocation3 + $0x70] sm:$0xff]   ;;  %v2136_v30 = vld [vmem:[#allocation3 + $0x78] sm:$0xff]  }
  0x1b   :  { %1832 = vmatprep.subr.bf16.mxu1 %v2117_v11  ;;  %v2133_v27 = vld [vmem:[#allocation3 + $0xf0] sm:$0xff]   ;;  %v2137_v31 = vld [vmem:[#allocation3 + $0xf8] sm:$0xff]   ;;  %v39_v34 = vld [vmem:[%s2488_s3] sm:$0xff] }
  0x1c   :  { %v2134_v28 = vld [vmem:[#allocation3 + $0x30] sm:$0xff]   ;;  %v2138_v32 = vld [vmem:[#allocation3 + $0x38] sm:$0xff]   ;;  %v40_v35 = vld [vmem:[%s2488_s3 + $0x8] sm:$0xff]  ;;  %v1668_v36 = vcombine.low %v39_v34, %v39_v34  ;;  %v1669_v37 = vcombine.high %v39_v34, %v39_v34 }
  0x1d   :  { %1811 = vmatpush3.bf16.msra.mxu0 %v2118_v12  ;;  %v2135_v29 = vld [vmem:[#allocation3 + $0xb0] sm:$0xff]   ;;  %v2139_v33 = vld [vmem:[#allocation3 + $0xb8] sm:$0xff]   ;;  %v1670_v38 = vcombine.low %v40_v35, %v40_v35  ;;  %v1671_v39 = vcombine.high %v40_v35, %v40_v35  ;;  %v2144_v40 = vld [vmem:[#allocation3 + $0x140] sm:$0xff]  }
  0x1e   :  { %1833 = vmatpush3.bf16.msra.mxu1 %v2119_v13  ;;  %1812 = vmatprep.subr.bf16.mxu0 %v2120_v14  ;;  %v2145_v41 = vld [vmem:[#allocation3 + $0x1c0] sm:$0xff]   ;;  %v2148_v44 = vld [vmem:[#allocation3 + $0x148] sm:$0xff]   ;;  %v2152_v48 = vld [vmem:[#allocation3 + $0x150] sm:$0xff]  }
  0x1f   :  { %1834 = vmatprep.subr.bf16.mxu1 %v2121_v15  ;;  %620 = vmatprep.mubr.bf16.mxu0 %v1669_v37  ;;  %v2146_v42 = vld [vmem:[#allocation3 + $0x100] sm:$0xff]   ;;  %v2149_v45 = vld [vmem:[#allocation3 + $0x1c8] sm:$0xff]   ;;  %v2153_v49 = vld [vmem:[#allocation3 + $0x1d0] sm:$0xff]  }
  0x20   :  { %660 = vmatprep.mubr.bf16.mxu1 %v1671_v39  ;;  %v2147_v43 = vld [vmem:[#allocation3 + $0x180] sm:$0xff]   ;;  %v2150_v46 = vld [vmem:[#allocation3 + $0x108] sm:$0xff]   ;;  %v2154_v50 = vld [vmem:[#allocation3 + $0x110] sm:$0xff]  }
  0x21   :  { %1813 = vmatpush3.bf16.msra.mxu0 %v2122_v16  ;;  %v2151_v47 = vld [vmem:[#allocation3 + $0x188] sm:$0xff]   ;;  %v2155_v51 = vld [vmem:[#allocation3 + $0x190] sm:$0xff]   ;;  %v2156_v52 = vld [vmem:[#allocation3 + $0x158] sm:$0xff]  }
  0x22   :  { %1835 = vmatpush3.bf16.msra.mxu1 %v2123_v17  ;;  %1814 = vmatprep.subr.bf16.mxu0 %v2124_v18  ;;  %v2157_v53 = vld [vmem:[#allocation3 + $0x1d8] sm:$0xff]   ;;  %v2160_v56 = vld [vmem:[#allocation3 + $0x160] sm:$0xff]   ;;  %v2164_v60 = vld [vmem:[#allocation3 + $0x168] sm:$0xff]   ;;  %v2269_v17 = vmov 3   ;;  %v2270_v18 = vmov 5  }
  0x23   :  { %1836 = vmatprep.subr.bf16.mxu1 %v2125_v19  ;;  %v2158_v54 = vld [vmem:[#allocation3 + $0x118] sm:$0xff]   ;;  %v2161_v57 = vld [vmem:[#allocation3 + $0x1e0] sm:$0xff]   ;;  %v2165_v61 = vld [vmem:[#allocation3 + $0x1e8] sm:$0xff]   ;;  %v2271_v19 = vmov 4  }
  0x24   :  { %v2159_v55 = vld [vmem:[#allocation3 + $0x198] sm:$0xff]   ;;  %v2162_v58 = vld [vmem:[#allocation3 + $0x120] sm:$0xff]   ;;  %v2166_v62 = vld [vmem:[#allocation3 + $0x128] sm:$0xff]  }
  0x25   :  { %1815 = vmatpush3.bf16.msra.mxu0 %v2126_v20  ;;  %v2163_v59 = vld [vmem:[#allocation3 + $0x1a0] sm:$0xff]   ;;  %v2167_v63 = vld [vmem:[#allocation3 + $0x1a8] sm:$0xff]   ;;  %v2168_v2 = vld [vmem:[#allocation3 + $0x170] sm:$0xff]   ;;  %v2272_v20 = vmov 0  }
  0x26   :  { %1837 = vmatpush3.bf16.msra.mxu1 %v2127_v21  ;;  %1816 = vmatprep.subr.bf16.mxu0 %v2128_v22  ;;  %v2169_v3 = vld [vmem:[#allocation3 + $0x1f0] sm:$0xff]   ;;  %v2172_v6 = vld [vmem:[#allocation3 + $0x178] sm:$0xff]   ;;  %v1000_v14 = vld [vmem:[%s2486_s1] sm:$0xff]  ;;  %v2273_v22 = vmov 6   ;;  %s2278_s1 = smov 4.6051702  }
  0x27   :  { %1838 = vmatprep.subr.bf16.mxu1 %v2129_v23  ;;  %v2170_v4 = vld [vmem:[#allocation3 + $0x130] sm:$0xff]   ;;  %v2173_v7 = vld [vmem:[#allocation3 + $0x1f8] sm:$0xff]   ;;  %1026 = vperm.xlu1 %2093, %v1000_v14   ;;  %v1001_v21 = vld [vmem:[%s2487_s2] sm:$0xff]  ;;  %v2274_v23 = vmov 7  }
  0x28   :  { %v2171_v5 = vld [vmem:[#allocation3 + $0x1b0] sm:$0xff]   ;;  %v2174_v8 = vld [vmem:[#allocation3 + $0x138] sm:$0xff]   ;;  %1015 = vperm.xlu0 %2092, %v1000_v14   ;;  %v2201_v37 = vld [vmem:[#allocation3 + $0x2e8] sm:$0xff]  }
  0x29   :  { %1817 = vmatpush3.bf16.msra.mxu0 %v2130_v24  ;;  %v2175_v9 = vld [vmem:[#allocation3 + $0x1b8] sm:$0xff]   ;;  %v41_v10 = vld [vmem:[%s2488_s3 + $0x10] sm:$0xff]  ;;  %v2180_v24 = vld [vmem:[#allocation3 + $0x280] sm:$0xff]  }
  0x2a   :  { %1839 = vmatpush3.bf16.msra.mxu1 %v2131_v25  ;;  %1818 = vmatprep.subr.bf16.mxu0 %v2132_v26  ;;  %v1672_v11 = vcombine.low %v41_v10, %v41_v10  ;;  %v1673_v12 = vcombine.high %v41_v10, %v41_v10  ;;  %v42_v13 = vld [vmem:[%s2488_s3 + $0x18] sm:$0xff]  ;;  %v2275_v25 = vmov 0.0   ;;  %v2198_v34 = vld [vmem:[#allocation3 + $0x2d0] sm:$0xff]   ;;  %s1581_s3 = smin.f32 %s2278_s1, %s1580_s19 }
  0x2b   :  { %1840 = vmatprep.subr.bf16.mxu1 %v2133_v27  ;;  %v1674_v15 = vcombine.low %v42_v13, %v42_v13  ;;  %v1675_v16 = vcombine.high %v42_v13, %v42_v13  ;;  %2094 = vset.pattern.permute.xlu1 %v2269_v17  ;;  %1660 = vst [vmem:[%s2491_s6 + $0x10] sm:$0xff] %v2275_v25  ;;  %v2183_v26 = vld [vmem:[#allocation3 + $0x298] sm:$0xff]   ;;  %v2184_v27 = vld [vmem:[#allocation3 + $0x2a0] sm:$0xff]  }
  0x2c   :  { %1037 = vperm.xlu1 %2094, %v1000_v14   ;;  %2096 = vset.pattern.permute.xlu0 %v2270_v18  ;;  %v2199_v35 = vld [vmem:[#allocation3 + $0x2d8] sm:$0xff]  }
  0x2d   :  { %1819 = vmatpush3.bf16.msra.mxu0 %v2134_v28  ;;  %1059 = vperm.xlu0 %2096, %v1000_v14   ;;  %v2185_v28 = vld [vmem:[#allocation3 + $0x2a8] sm:$0xff]  }
  0x2e   :  { %1841 = vmatpush3.bf16.msra.mxu1 %v2135_v29  ;;  %1820 = vmatprep.subr.bf16.mxu0 %v2136_v30  ;;  %v2186_v29 = vld [vmem:[#allocation3 + $0x2b0] sm:$0xff]   ;;  %v2187_v30 = vld [vmem:[#allocation3 + $0x2b8] sm:$0xff]  }
  0x2f   :  { %1842 = vmatprep.subr.bf16.mxu1 %v2137_v31  ;;  %v2196_v31 = vld [vmem:[#allocation3 + $0x2c0] sm:$0xff]  }
  0x30   :  { %2095 = vset.pattern.permute.xlu1 %v2271_v19 }
  0x31   :  { %1821 = vmatpush3.bf16.msra.mxu0 %v2138_v32  ;;  %1048 = vperm.xlu1 %2095, %v1000_v14   ;;  %v1099_v32 = vsel %vm1098_vm1, %v1001_v21, 0.0 }
  0x32   :  { %1843 = vmatpush3.bf16.msra.mxu1 %v2139_v33  ;;  %1850 = vmatprep.subr.bf16.mxu0 %v2144_v40  ;;  %v2197_v33 = vld [vmem:[#allocation3 + $0x2c8] sm:$0xff]  }
  0x33   :  { %1872 = vmatprep.subr.bf16.mxu1 %v2145_v41  ;;  %2097 = vset.pattern.permute.xlu0 %v2272_v20 }
  0x34   :  { %621 = vmatmul.mubr.bf16.vlgmr.msra.gmra.mrb[0].mxu0 %v1668_v36  ;;  %1003 = vperm.xlu0 %2097, %v1000_v14   ;;  %v2200_v36 = vld [vmem:[#allocation3 + $0x2e0] sm:$0xff]  }
  0x35   :  { %661 = vmatmul.mubr.bf16.vlgmr.msra.gmra.mrb[0].mxu1 %v1670_v38  ;;  %1851 = vmatpush3.bf16.msra.mxu0 %v2146_v42  ;;  %v2202_v38 = vld [vmem:[#allocation3 + $0x2f0] sm:$0xff]  }
  0x36   :  { %1873 = vmatpush3.bf16.msra.mxu1 %v2147_v43  ;;  %1852 = vmatprep.subr.bf16.mxu0 %v2148_v44  ;;  %v1667_v43 = vld [vmem:[%s2490_s5] ss:$0 sm:$0xff] }
  0x37   :  { %1874 = vmatprep.subr.bf16.mxu1 %v2149_v45  ;;  %700 = vmatprep.mubr.bf16.mxu0 %v1673_v12  ;;  %v2188_v12 = vld [vmem:[#allocation3 + $0x200] sm:$0xff]  }
  0x38   :  { %740 = vmatprep.mubr.bf16.mxu1 %v1675_v16  ;;  %2098 = vset.pattern.permute.xlu1 %v2273_v22 }
  0x39   :  { %1853 = vmatpush3.bf16.msra.mxu0 %v2150_v46  ;;  %1070 = vperm.xlu1 %2098, %v1000_v14  }
  0x3a   :  { %1875 = vmatpush3.bf16.msra.mxu1 %v2151_v47  ;;  %1854 = vmatprep.subr.bf16.mxu0 %v2152_v48 }
  0x3b   :  { %1876 = vmatprep.subr.bf16.mxu1 %v2153_v49  ;;  %1010 = vperm.xlu0 %2097, %v1001_v21  }
  0x3d   :  { %1855 = vmatpush3.bf16.msra.mxu0 %v2154_v50  ;;  %2099 = vset.pattern.permute.xlu1 %v2274_v23 }
  0x3e   :  { %1877 = vmatpush3.bf16.msra.mxu1 %v2155_v51  ;;  %1856 = vmatprep.subr.bf16.mxu0 %v2156_v52 }
  0x3f   :  { %1878 = vmatprep.subr.bf16.mxu1 %v2157_v53  ;;  %2102 = vset.pattern.permute.xlu0 %v2269_v17  ;;  %v2189_v17 = vld [vmem:[#allocation3 + $0x208] sm:$0xff]  }
  0x40   :  { %1081 = vperm.xlu1 %2099, %v1000_v14   ;;  %1043 = vperm.xlu0 %2102, %v1001_v21  }
  0x41   :  { %1857 = vmatpush3.bf16.msra.mxu0 %v2158_v54 }
  0x42   :  { %1879 = vmatpush3.bf16.msra.mxu1 %v2159_v55  ;;  %1858 = vmatprep.subr.bf16.mxu0 %v2160_v56 }
  0x43   :  { %1880 = vmatprep.subr.bf16.mxu1 %v2161_v57 }
  0x44   :  { %2100 = vset.pattern.permute.xlu1 %v2268_v1  ;;  %2105 = vset.pattern.permute.xlu0 %v2273_v22  ;;  %v2182_v1 = vld [vmem:[#allocation3 + $0x290] sm:$0xff]   ;;  %v2191_v22 = vld [vmem:[#allocation3 + $0x218] sm:$0xff]  }
  0x45   :  { %1859 = vmatpush3.bf16.msra.mxu0 %v2162_v58  ;;  %1021 = vperm.xlu1 %2100, %v1001_v21  }
  0x46   :  { %1881 = vmatpush3.bf16.msra.mxu1 %v2163_v59  ;;  %1860 = vmatprep.subr.bf16.mxu0 %v2164_v60 }
  0x47   :  { %1882 = vmatprep.subr.bf16.mxu1 %v2165_v61  ;;  %1076 = vperm.xlu0 %2105, %v1001_v21  }
  0x49   :  { %1861 = vmatpush3.bf16.msra.mxu0 %v2166_v62  ;;  %2101 = vset.pattern.permute.xlu1 %v2267_v0  ;;  %v2181_v0 = vld [vmem:[#allocation3 + $0x288] sm:$0xff]  }
  0x4a   :  { %1883 = vmatpush3.bf16.msra.mxu1 %v2167_v63  ;;  %1862 = vmatprep.subr.bf16.mxu0 %v2168_v2 }
  0x4b   :  { %1884 = vmatprep.subr.bf16.mxu1 %v2169_v3  ;;  %2107 = vset.pattern.permute.xlu0 %v2274_v23 }
  0x4c   :  { %1032 = vperm.xlu1 %2101, %v1001_v21  }
  0x4d   :  { %1863 = vmatpush3.bf16.msra.mxu0 %v2170_v4 }
  0x4e   :  { %1885 = vmatpush3.bf16.msra.mxu1 %v2171_v5  ;;  %1864 = vmatprep.subr.bf16.mxu0 %v2172_v6 }
  0x4f   :  { %1886 = vmatprep.subr.bf16.mxu1 %v2173_v7 }
  0x50   :  { %2103 = vset.pattern.permute.xlu1 %v2271_v19 }
  0x51   :  { %1865 = vmatpush3.bf16.msra.mxu0 %v2174_v8  ;;  %1054 = vperm.xlu1 %2103, %v1001_v21  }
  0x52   :  { %1887 = vmatpush3.bf16.msra.mxu1 %v2175_v9  ;;  %1950 = vmatprep.subr.bf16.mxu0 %v2275_v25 }
  0x53   :  { %1970 = vmatprep.subr.bf16.mxu1 %v2275_v25 }
  0x54   :  { %701 = vmatmul.mubr.bf16.vlgmr.msra.gmra.mrb[4].mxu0 %v1672_v11 }
  0x55   :  { %741 = vmatmul.mubr.bf16.vlgmr.msra.gmra.mrb[4].mxu1 %v1674_v15  ;;  %2104 = vset.pattern.permute.xlu1 %v2270_v18  ;;  %v971_v15 = vlaneseq }
  0x56   :  { %1065 = vperm.xlu1 %2104, %v1001_v21   ;;  %1951 = vmatpush3.bf16.msra.mxu0 %v2180_v24 }
  0x57   :  { %1952 = vmatprep.subr.bf16.mxu0 %v2275_v25  ;;  %1966 = vmatprep.mubr.msk.bf16.mxu0 %vm2276_vm0, %v2275_v25  ;;  %v2384_v18 = vand.u32 127, %v971_v15 }
  0x58   :  { %1986 = vmatprep.mubr.msk.bf16.mxu1 %vm2276_vm0, %v2275_v25  ;;  %1971 = vmatpush3.bf16.msra.mxu1 %v2196_v31 }
  0x59   :  { %1972 = vmatprep.subr.bf16.mxu1 %v2275_v25  ;;  %vm973_vm10 = vcmp.lt.s32.totalorder %v2384_v18, 32 }
  0x5a   :  { %2106 = vset.pattern.permute.xlu1 %v2274_v23  ;;  %1953 = vmatpush3.bf16.msra.mxu0 %v2181_v0 }
  0x5b   :  { %1087 = vperm.xlu1 %2106, %v1001_v21   ;;  %1954 = vmatprep.subr.bf16.mxu0 %v2275_v25  ;;  %v2190_v21 = vld [vmem:[#allocation3 + $0x210] sm:$0xff]  }
  0x5c   :  { %1973 = vmatpush3.bf16.msra.mxu1 %v2197_v33 }
  0x5d   :  { %1974 = vmatprep.subr.bf16.mxu1 %v2275_v25 }
  0x5e   :  { %1955 = vmatpush3.bf16.msra.mxu0 %v2182_v1 }
  0x5f   :  { %1956 = vmatprep.subr.bf16.mxu0 %v2275_v25 }
  0x60   :  { %1975 = vmatpush3.bf16.msra.mxu1 %v2198_v34 }
  0x61   :  { %1976 = vmatprep.subr.bf16.mxu1 %v2275_v25 }
  0x62   :  { %1957 = vmatpush3.bf16.msra.mxu0 %v2183_v26 }
  0x63   :  { %1958 = vmatprep.subr.bf16.mxu0 %v2275_v25 }
  0x64   :  { %1977 = vmatpush3.bf16.msra.mxu1 %v2199_v35 }
  0x65   :  { %1978 = vmatprep.subr.bf16.mxu1 %v2275_v25 }
  0x66   :  { %1959 = vmatpush3.bf16.msra.mxu0 %v2184_v27 }
  0x67   :  { %1960 = vmatprep.subr.bf16.mxu0 %v2275_v25 }
  0x68   :  { %1979 = vmatpush3.bf16.msra.mxu1 %v2200_v36  ;;  %v2192_v36 = vld [vmem:[#allocation3 + $0x220] sm:$0xff]  }
  0x69   :  { %1980 = vmatprep.subr.bf16.mxu1 %v2275_v25 }
  0x6a   :  { %1961 = vmatpush3.bf16.msra.mxu0 %v2185_v28 }
  0x6b   :  { %1962 = vmatprep.subr.bf16.mxu0 %v2275_v25 }
  0x6c   :  { %1981 = vmatpush3.bf16.msra.mxu1 %v2201_v37 }
  0x6d   :  { %1982 = vmatprep.subr.bf16.mxu1 %v2275_v25 }
  0x6e   :  { %1963 = vmatpush3.bf16.msra.mxu0 %v2186_v29 }
  0x6f   :  { %1964 = vmatprep.subr.bf16.mxu0 %v2275_v25 }
  0x70   :  { %1983 = vmatpush3.bf16.msra.mxu1 %v2202_v38 }
  0x71   :  { %1984 = vmatprep.subr.bf16.mxu1 %v2275_v25 }
  0x72   :  { %1965 = vmatpush3.bf16.msra.mxu0 %v2187_v30 }
  0x73   :  { %1990 = vmatprep.subr.bf16.mxu0 %v2275_v25 }
  0x7f   :  { %1100 = vadd.xlane.f32.xlu1 %v1099_v32 }
  0xa6   :  { %v2374_v39 = vpop.permute.xlu1 %1026 }
  0xa7   :  { %v1016_v57 = vpop.permute.xlu0 %1015  ;;  %vm1028_vm6 = vcmp.eq.s32.totalorder %v2374_v39, %v2384_v18 }
  0xa8   :  { %vm1017_vm4 = vcmp.eq.s32.totalorder %v1016_v57, %v2384_v18  ;;  %v1763_v27 = vsel %vm1028_vm6, 1.0, %v2275_v25 }
  0xa9   :  { %v1762_v23 = vsel %vm1017_vm4, 1.0, %v2275_v25 }
  0xab   :  { %v2376_v40 = vpop.permute.xlu1 %1037 }
  0xac   :  { %v1060_v59 = vpop.permute.xlu0 %1059  ;;  %vm1039_vm2 = vcmp.eq.s32.totalorder %v2376_v40, %v2384_v18 }
  0xad   :  { %vm1061_vm9 = vcmp.eq.s32.totalorder %v1060_v59, %v2384_v18  ;;  %v1764_v0 = vsel %vm1039_vm2, 1.0, %v2275_v25 }
  0xae   :  { %v1766_v29 = vsel %vm1061_vm9, 1.0, %v2275_v25 }
  0xb0   :  { %v1049_v54 = vpop.permute.xlu1 %1048 }
  0xb1   :  { %vm1050_vm7 = vcmp.eq.s32.totalorder %v1049_v54, %v2384_v18 }
  0xb2   :  { %v1765_v28 = vsel %vm1050_vm7, 1.0, %v2275_v25 }
  0xb3   :  { %v1004_v61 = vpop.permute.xlu0 %1003 }
  0xb4   :  { %vm1005_vm5 = vcmp.eq.s32.totalorder %v1004_v61, %v2384_v18 }
  0xb5   :  { %v1761_v24 = vsel %vm1005_vm5, 1.0, %v2275_v25 }
  0xb8   :  { %v1071_v55 = vpop.permute.xlu1 %1070 }
  0xb9   :  { %vm1072_vm3 = vcmp.eq.s32.totalorder %v1071_v55, %v2384_v18 }
  0xba   :  { %v1011_v13 = vpop.permute.xlu0 %1010  ;;  %v1767_v1 = vsel %vm1072_vm3, 1.0, %v2275_v25 }
  0xbb   :  { %v1013_v33 = vmul.f32 %v1761_v24, %v1011_v13  ;;  %v2219_v24 = vld [vmem:[#allocation3 + $0x338] sm:$0xff]  }
  0xbf   :  { %v1082_v56 = vpop.permute.xlu1 %1081  ;;  %v1044_v19 = vpop.permute.xlu0 %1043 }
  0xc0   :  { %vm1083_vm8 = vcmp.eq.s32.totalorder %v1082_v56, %v2384_v18  ;;  %v1046_v34 = vmul.f32 %v1764_v0, %v1044_v19  ;;  %v2214_v19 = vld [vmem:[#allocation3 + $0x310] sm:$0xff]   ;;  %v2220_v0 = vld [vmem:[#allocation3 + $0x340] sm:$0xff]  }
  0xc1   :  { %v1768_v30 = vsel %vm1083_vm8, 1.0, %v2275_v25 }
  0xc4   :  { %v1022_v58 = vpop.permute.xlu1 %1021 }
  0xc5   :  { %v1024_v32 = vmul.f32 %v1762_v23, %v1022_v58  ;;  %v2218_v23 = vld [vmem:[#allocation3 + $0x330] sm:$0xff]  }
  0xc6   :  { %v1077_v26 = vpop.permute.xlu0 %1076 }
  0xc7   :  { %v1079_v35 = vmul.f32 %v1767_v1, %v1077_v26  ;;  %v2221_v1 = vld [vmem:[#allocation3 + $0x348] sm:$0xff]   ;;  %v2222_v26 = vld [vmem:[#allocation3 + $0x350] sm:$0xff]  }
  0xcb   :  { %v1033_v60 = vpop.permute.xlu1 %1032 }
  0xcc   :  { %v1035_v37 = vmul.f32 %v1763_v27, %v1033_v60  ;;  %v2204_v60 = vld [vmem:[#allocation3 + $0x240] sm:$0xff]   ;;  %v2223_v27 = vld [vmem:[#allocation3 + $0x358] sm:$0xff]  }
  0xd0   :  { %v1055_v16 = vpop.permute.xlu1 %1054 }
  0xd1   :  { %v1057_v38 = vmul.f32 %v1765_v28, %v1055_v16  ;;  %v2212_v16 = vld [vmem:[#allocation3 + $0x300] sm:$0xff]  }
  0xd2   :  { %v2224_v28 = vld [vmem:[#allocation3 + $0x360] sm:$0xff]  }
  0xd5   :  { %v1066_v20 = vpop.permute.xlu1 %1065 }
  0xd6   :  { %v1068_v39 = vmul.f32 %v1766_v29, %v1066_v20  ;;  %v2215_v20 = vld [vmem:[#allocation3 + $0x318] sm:$0xff]   ;;  %v2225_v29 = vld [vmem:[#allocation3 + $0x368] sm:$0xff]  }
  0xda   :  { %v1088_v31 = vpop.permute.xlu1 %1087 }
  0xdb   :  { %v1090_v40 = vmul.f32 %v1768_v30, %v1088_v31 }
 0x107   :  { %v1822_v41 = vpop.f32.mrb[0].mxu0 }
 0x108   :  { %v1844_v42 = vpop.f32.mrb[0].mxu1  ;;  %v1823_v44 = vpop.f32.mrb[1].mxu0 }
 0x109   :  { %v1845_v45 = vpop.f32.mrb[1].mxu1  ;;  %v1824_v46 = vadd.f32 %v1823_v44, %v1822_v41  ;;  %v1825_v48 = vpop.f32.mrb[2].mxu0  ;;  %v2193_v41 = vld [vmem:[#allocation3 + $0x228] sm:$0xff]   ;;  %v1092_v44 = vadd.f32 %v1046_v34, %v1035_v37  ;;  %v1777_v34 = vld [vmem:[%s2490_s5 + $0x1] ss:$0 sm:$0xff] }
 0x10a   :  { %v1846_v47 = vadd.f32 %v1845_v45, %v1844_v42  ;;  %v1847_v49 = vpop.f32.mrb[2].mxu1  ;;  %v1826_v50 = vpop.f32.mrb[3].mxu0  ;;  %v1091_v42 = vadd.f32 %v1024_v32, %v1013_v33  ;;  %v1094_v45 = vadd.f32 %v1090_v40, %v1079_v35 }
 0x10b   :  { %v1848_v51 = vpop.f32.mrb[3].mxu1  ;;  %v623_v52 = vadd.f32 %v1824_v46, %v1667_v43  ;;  %v1093_v43 = vadd.f32 %v1068_v39, %v1057_v38  ;;  %v2194_v46 = vld [vmem:[#allocation3 + $0x230] sm:$0xff]   ;;  %v2195_v49 = vld [vmem:[#allocation3 + $0x238] sm:$0xff]  }
 0x10d   :  { %v663_v53 = vadd.f32 %v1846_v47, %v623_v52  ;;  %v1095_v47 = vadd.f32 %v1092_v44, %v1091_v42  ;;  %v1096_v48 = vadd.f32 %v1094_v45, %v1093_v43  ;;  %v2203_v52 = vld [vmem:[#allocation3 + $0x2f8] sm:$0xff]   ;;  %v1786_v43 = vld [vmem:[%s2490_s5 + $0x6] ss:$0 sm:$0xff] }
 0x10e   :  { %1985 = vmatpush3.bf16.msra.mxu1 %v2203_v52  ;;  %v2227_v42 = vld [vmem:[#allocation3 + $0x378] sm:$0xff]   ;;  %v1749_v52 = vld [vmem:[%s2490_s5 + $0x3] ss:$0 sm:$0xff] }
 0x10f   :  { %v1097_v50 = vadd.f32 %v1096_v48, %v1095_v47  ;;  %2010 = vmatprep.subr.bf16.mxu1 %v2275_v25 }
 0x111   :  { %v1102_v51 = vpack.c.bf16 %v1097_v50, %v1097_v50 }
 0x127   :  { %v1866_v62 = vpop.f32.mrb[4].mxu0 }
 0x128   :  { %v1888_v63 = vpop.f32.mrb[4].mxu1  ;;  %v1867_v2 = vpop.f32.mrb[5].mxu0 }
 0x129   :  { %v1889_v3 = vpop.f32.mrb[5].mxu1  ;;  %v1868_v4 = vadd.f32 %v1867_v2, %v1866_v62  ;;  %v1869_v6 = vpop.f32.mrb[6].mxu0  ;;  %v2205_v62 = vld [vmem:[#allocation3 + $0x248] sm:$0xff]  }
 0x12a   :  { %v1890_v5 = vadd.f32 %v1889_v3, %v1888_v63  ;;  %v1891_v7 = vpop.f32.mrb[6].mxu1  ;;  %v1870_v8 = vpop.f32.mrb[7].mxu0  ;;  %v2206_v63 = vld [vmem:[#allocation3 + $0x250] sm:$0xff]   ;;  %v2209_v6 = vld [vmem:[#allocation3 + $0x268] sm:$0xff]  }
 0x12b   :  { %v1892_v9 = vpop.f32.mrb[7].mxu1  ;;  %v703_v10 = vadd.f32 %v1868_v4, %v663_v53  ;;  %v1740_v53 = vld [vmem:[%s2490_s5 + $0x2] ss:$0 sm:$0xff]  ;;  %v1101_v2 = vpop.xlane.xlu1 %1100  ;;  %v2207_v4 = vld [vmem:[#allocation3 + $0x258] sm:$0xff]   ;;  %v2210_v7 = vld [vmem:[#allocation3 + $0x270] sm:$0xff]  }
 0x12c   :  { %v1207_v3 = vmax.f32 %v1101_v2, 1.0 }
 0x12d   :  { %v743_v11 = vadd.f32 %v1890_v5, %v703_v10  ;;  %v2208_v5 = vld [vmem:[#allocation3 + $0x260] sm:$0xff]   ;;  %v2211_v10 = vld [vmem:[#allocation3 + $0x278] sm:$0xff]  }
 0x12e   :  { %2228 = vrcp.f32 %v1207_v3 }
 0x12f   :  { %v784_v14 = vpack.c.bf16 %v743_v11, %v743_v11 }
 0x131   :  { %1967 = vmatmul.mubr.bf16.vlgmr.msra.gmra.mrb[8].mxu0 %v784_v14 }
 0x132   :  { %1991 = vmatpush3.bf16.msra.mxu0 %v2188_v12  ;;  %2006 = vmatprep.mubr.msk.bf16.mxu0 %vm2276_vm0, %v2275_v25 }
 0x133   :  { %1992 = vmatprep.subr.bf16.mxu0 %v2275_v25 }
 0x136   :  { %1993 = vmatpush3.bf16.msra.mxu0 %v2189_v17  ;;  %v2213_v17 = vld [vmem:[#allocation3 + $0x308] sm:$0xff]  }
 0x137   :  { %1994 = vmatprep.subr.bf16.mxu0 %v2275_v25 }
 0x138   :  { %v2229_v8 = vpop.eup %2228 }
 0x13a   :  { %1995 = vmatpush3.bf16.msra.mxu0 %v2190_v21  ;;  %v2216_v21 = vld [vmem:[#allocation3 + $0x320] sm:$0xff]  }
 0x13b   :  { %1996 = vmatprep.subr.bf16.mxu0 %v2275_v25 }
 0x13e   :  { %1997 = vmatpush3.bf16.msra.mxu0 %v2191_v22  ;;  %v2217_v22 = vld [vmem:[#allocation3 + $0x328] sm:$0xff]  }
 0x13f   :  { %1998 = vmatprep.subr.bf16.mxu0 %v2275_v25 }
 0x142   :  { %1999 = vmatpush3.bf16.msra.mxu0 %v2192_v36 }
 0x143   :  { %2000 = vmatprep.subr.bf16.mxu0 %v2275_v25 }
 0x146   :  { %2001 = vmatpush3.bf16.msra.mxu0 %v2193_v41  ;;  %v2226_v41 = vld [vmem:[#allocation3 + $0x370] sm:$0xff]  }
 0x147   :  { %2002 = vmatprep.subr.bf16.mxu0 %v2275_v25 }
 0x14a   :  { %2003 = vmatpush3.bf16.msra.mxu0 %v2194_v46 }
 0x14b   :  { %2004 = vmatprep.subr.bf16.mxu0 %v2275_v25 }
 0x14e   :  { %2005 = vmatpush3.bf16.msra.mxu0 %v2195_v49 }
 0x14f   :  { %2030 = vmatprep.subr.bf16.mxu0 %v2275_v25 }
 0x151   :  { %2007 = vmatmul.mubr.bf16.vlgmr.msra.gmra.mrb[12].mxu0 %v1102_v51  ;;  %v1795_v51 = vld [vmem:[%s2490_s5 + $0x7] ss:$0 sm:$0xff] }
 0x152   :  { %2046 = vmatprep.mubr.msk.bf16.mxu0 %vm2276_vm0, %v2275_v25  ;;  %2031 = vmatpush3.bf16.msra.mxu0 %v2212_v16 }
 0x153   :  { %2032 = vmatprep.subr.bf16.mxu0 %v2275_v25 }
 0x156   :  { %2033 = vmatpush3.bf16.msra.mxu0 %v2213_v17  ;;  %v1805_v17 = vld [vmem:[%s2490_s5 + $0x9] ss:$0 sm:$0xff] }
 0x157   :  { %2034 = vmatprep.subr.bf16.mxu0 %v2275_v25 }
 0x15a   :  { %2035 = vmatpush3.bf16.msra.mxu0 %v2214_v19 }
 0x15b   :  { %2036 = vmatprep.subr.bf16.mxu0 %v2275_v25 }
 0x15e   :  { %2037 = vmatpush3.bf16.msra.mxu0 %v2215_v20 }
 0x15f   :  { %2038 = vmatprep.subr.bf16.mxu0 %v2275_v25 }
 0x162   :  { %2039 = vmatpush3.bf16.msra.mxu0 %v2216_v21  ;;  %v1759_v21 = vld [vmem:[%s2490_s5 + $0x4] ss:$0 sm:$0xff] }
 0x163   :  { %2040 = vmatprep.subr.bf16.mxu0 %v2275_v25 }
 0x166   :  { %2041 = vmatpush3.bf16.msra.mxu0 %v2217_v22 }
 0x167   :  { %2042 = vmatprep.subr.bf16.mxu0 %v2275_v25 }
 0x16a   :  { %2043 = vmatpush3.bf16.msra.mxu0 %v2218_v23 }
 0x16b   :  { %2044 = vmatprep.subr.bf16.mxu0 %v2275_v25 }
 0x16e   :  { %2045 = vmatpush3.bf16.msra.mxu0 %v2219_v24  ;;  %v1760_v24 = vld [vmem:[%s2490_s5 + $0x5] ss:$0 sm:$0xff] }
 0x16f   :  { %2070 = vmatprep.subr.mxu0 %v2275_v25 }
 0x204   :  { %v871_v54 = vpop.f32.mrb[8].mxu0 }
 0x205   :  { %v872_v55 = vadd.f32 %v1740_v53, %v871_v54  ;;  %v1968_v56 = vpop.f32.mrb[9].mxu0 }
 0x206   :  { %v874_v57 = vpop.f32.mrb[10].mxu0 }
 0x207   :  { %v877_v58 = vmax.f32 %v872_v55, 0.0  ;;  %v1969_v59 = vpop.f32.mrb[11].mxu0  ;;  %v1758_v57 = vsel %vm973_vm10, 1.0, %v2275_v25 }
 0x209   :  { %v878_v61 = vpack.c.bf16 %v877_v58, %v877_v58 }
 0x20b   :  { %1987 = vmatmul.mubr.bf16.vlgmr.msra.gmra.mrb[8].mxu1 %v878_v61 }
 0x20c   :  { %2011 = vmatpush3.bf16.msra.mxu1 %v2204_v60  ;;  %2026 = vmatprep.mubr.msk.bf16.mxu1 %vm2276_vm0, %v2275_v25 }
 0x20d   :  { %2012 = vmatprep.subr.bf16.mxu1 %v2275_v25 }
 0x210   :  { %2013 = vmatpush3.bf16.msra.mxu1 %v2205_v62 }
 0x211   :  { %2014 = vmatprep.subr.bf16.mxu1 %v2275_v25 }
 0x214   :  { %2015 = vmatpush3.bf16.msra.mxu1 %v2206_v63 }
 0x215   :  { %2016 = vmatprep.subr.bf16.mxu1 %v2275_v25 }
 0x218   :  { %2017 = vmatpush3.bf16.msra.mxu1 %v2207_v4 }
 0x219   :  { %2018 = vmatprep.subr.bf16.mxu1 %v2275_v25 }
 0x21c   :  { %2019 = vmatpush3.bf16.msra.mxu1 %v2208_v5 }
 0x21d   :  { %2020 = vmatprep.subr.bf16.mxu1 %v2275_v25 }
 0x220   :  { %2021 = vmatpush3.bf16.msra.mxu1 %v2209_v6 }
 0x221   :  { %2022 = vmatprep.subr.bf16.mxu1 %v2275_v25 }
 0x224   :  { %v1201_v9 = vpop.f32.mrb[12].mxu0  ;;  %2023 = vmatpush3.bf16.msra.mxu1 %v2210_v7 }
 0x225   :  { %v1209_v11 = vmul.f32 %v2229_v8, %v1201_v9  ;;  %v2008_v12 = vpop.f32.mrb[13].mxu0  ;;  %2024 = vmatprep.subr.bf16.mxu1 %v2275_v25 }
 0x226   :  { %v1204_v13 = vpop.f32.mrb[14].mxu0 }
 0x227   :  { %v2009_v14 = vpop.f32.mrb[15].mxu0  ;;  %v1210_v15 = vpack.c.bf16 %v1209_v11, %v1209_v11 }
 0x228   :  { %2025 = vmatpush3.bf16.msra.mxu1 %v2211_v10 }
 0x229   :  { %2050 = vmatprep.subr.bf16.mxu1 %v2275_v25 }
 0x22b   :  { %2027 = vmatmul.mubr.bf16.vlgmr.msra.gmra.mrb[12].mxu1 %v1210_v15  ;;  %v1804_v15 = vld [vmem:[%s2490_s5 + $0x8] ss:$0 sm:$0xff] }
 0x22c   :  { %2066 = vmatprep.mubr.msk.bf16.mxu1 %vm2276_vm0, %v2275_v25  ;;  %2051 = vmatpush3.bf16.msra.mxu1 %v2220_v0 }
 0x22d   :  { %2052 = vmatprep.subr.bf16.mxu1 %v2275_v25 }
 0x230   :  { %2053 = vmatpush3.bf16.msra.mxu1 %v2221_v1 }
 0x231   :  { %2054 = vmatprep.subr.bf16.mxu1 %v2275_v25 }
 0x234   :  { %2055 = vmatpush3.bf16.msra.mxu1 %v2222_v26 }
 0x235   :  { %2056 = vmatprep.subr.bf16.mxu1 %v2275_v25 }
 0x238   :  { %2057 = vmatpush3.bf16.msra.mxu1 %v2223_v27 }
 0x239   :  { %2058 = vmatprep.subr.bf16.mxu1 %v2275_v25 }
 0x23c   :  { %2059 = vmatpush3.bf16.msra.mxu1 %v2224_v28 }
 0x23d   :  { %2060 = vmatprep.subr.bf16.mxu1 %v2275_v25 }
 0x240   :  { %2061 = vmatpush3.bf16.msra.mxu1 %v2225_v29 }
 0x241   :  { %2062 = vmatprep.subr.bf16.mxu1 %v2275_v25 }
 0x244   :  { %2063 = vmatpush3.bf16.msra.mxu1 %v2226_v41 }
 0x245   :  { %2064 = vmatprep.subr.bf16.mxu1 %v2275_v25 }
 0x248   :  { %2065 = vmatpush3.bf16.msra.mxu1 %v2227_v42 }
 0x2de   :  { %v965_v30 = vpop.f32.mrb[8].mxu1 }
 0x2df   :  { %v1988_v31 = vpop.f32.mrb[9].mxu1  ;;  %v966_v58 = vadd.f32 %v1749_v52, %v965_v30  ;;  %v1582_v30 = vstv %s1581_s3 }
 0x2e0   :  { %v968_v32 = vpop.f32.mrb[10].mxu1  ;;  %v1583_v31 = vmul.f32 1.442695, %v1582_v30 }
 0x2e1   :  { %v1989_v33 = vpop.f32.mrb[11].mxu1  ;;  %v976_v61 = vmul.f32 %v1758_v57, %v966_v58 }
 0x2fe   :  { %v1314_v35 = vpop.f32.mrb[12].mxu1 }
 0x2ff   :  { %v1315_v36 = vadd.f32 %v1777_v34, %v1314_v35  ;;  %v2028_v37 = vpop.f32.mrb[13].mxu1 }
 0x300   :  { %v1317_v38 = vpop.f32.mrb[14].mxu1 }
 0x301   :  { %v1356_v39 = vpack.c.bf16 %v1315_v36, %v1315_v36  ;;  %v2029_v40 = vpop.f32.mrb[15].mxu1 }
 0x303   :  { %2047 = vmatmul.mubr.bf16.vlgmr.msra.gmra.mrb[16].mxu0 %v1356_v39 }
 0x304   :  { %2072 = vmatprep.mubr.msk.f32.mxu0 %vm2276_vm0, %v2275_v25 }
 0x3d6   :  { %v1443_v44 = vpop.f32.mrb[16].mxu0 }
 0x3d7   :  { %v1444_v45 = vadd.f32 %v1786_v43, %v1443_v44  ;;  %v2048_v46 = vpop.f32.mrb[17].mxu0 }
 0x3d8   :  { %v1446_v47 = vpop.f32.mrb[18].mxu0 }
 0x3d9   :  { %v1449_v48 = vmax.f32 %v1444_v45, 0.0  ;;  %v2049_v49 = vpop.f32.mrb[19].mxu0 }
 0x3db   :  { %v1450_v50 = vpack.c.bf16 %v1449_v48, %v1449_v48 }
 0x3dd   :  { %2067 = vmatmul.mubr.bf16.vlgmr.msra.gmra.mrb[16].mxu1 %v1450_v50 }
 0x4b0   :  { %v1537_v53 = vpop.f32.mrb[16].mxu1 }
 0x4b1   :  { %v1538_v54 = vadd.f32 %v1795_v51, %v1537_v53  ;;  %v2068_v55 = vpop.f32.mrb[17].mxu1 }
 0x4b2   :  { %v1540_v56 = vpop.f32.mrb[18].mxu1 }
 0x4b3   :  { %v2069_v59 = vpop.f32.mrb[19].mxu1  ;;  %v1543_v60 = vmul.f32 %v1758_v57, %v1538_v54 }
 0x4b5   :  { %1544 = vadd.xlane.f32.xlu0 %v1543_v60 }
 0x4b9   :  { %977 = vadd.xlane.f32.xlu0 %v976_v61 }
 0x542   :  { %v1545_v62 = vpop.xlane.xlu0 %1544 }
 0x543   :  { %v1546_v63 = vmul.f32 0.03125, %v1545_v62 }
 0x545   :  { %v1547_v2 = vsub.f32 %v1538_v54, %v1546_v63 }
 0x546   :  { %v978_v18 = vpop.xlane.xlu0 %977 }
 0x547   :  { %v979_v3 = vmul.f32 0.03125, %v978_v18  ;;  %v1548_v4 = vmul.f32 %v1758_v57, %v1547_v2 }
 0x549   :  { %v980_v5 = vsub.f32 %v966_v58, %v979_v3  ;;  %v1549_v6 = vmul.f32 %v1548_v4, %v1548_v4 }
 0x54b   :  { %1550 = vadd.xlane.f32.xlu1 %v1549_v6  ;;  %v981_v7 = vmul.f32 %v1758_v57, %v980_v5 }
 0x54d   :  { %v982_v8 = vmul.f32 %v981_v7, %v981_v7 }
 0x54f   :  { %983 = vadd.xlane.f32.xlu0 %v982_v8 }
 0x5d8   :  { %v1551_v9 = vpop.xlane.xlu1 %1550 }
 0x5d9   :  { %v1552_v25 = vmul.f32 0.03125, %v1551_v9 }
 0x5db   :  { %v1553_v10 = vadd.f32 1e-05, %v1552_v25 }
 0x5dc   :  { %v984_v11 = vpop.xlane.xlu0 %983 }
 0x5dd   :  { %2230 = vrsqrt.f32 %v1553_v10  ;;  %v985_v12 = vmul.f32 0.03125, %v984_v11 }
 0x5df   :  { %v986_v13 = vadd.f32 1e-05, %v985_v12 }
 0x5e1   :  { %2232 = vrsqrt.f32 %v986_v13 }
 0x5e2   :  { %2234 = vpow2.f32 %v1583_v31 }
 0x5e7   :  { %v2231_v14 = vpop.eup %2230 }
 0x5e8   :  { %v1555_v16 = vmul.f32 %v2231_v14, %v1548_v4 }
 0x5ea   :  { %v1560_v19 = vmul.f32 %v1804_v15, %v1555_v16 }
 0x5eb   :  { %v2233_v20 = vpop.eup %2232 }
 0x5ec   :  { %v1565_v22 = vadd.f32 %v1805_v17, %v1560_v19  ;;  %v988_v23 = vmul.f32 %v2233_v20, %v981_v7  ;;  %v2235_v32 = vpop.eup %2234 }
 0x5ed   :  { %2075 = vpush %v2235_v32 }
 0x5ee   :  { %v1566_v0 = vmul.f32 %v1758_v57, %v1565_v22  ;;  %v993_v1 = vmul.f32 %v1759_v21, %v988_v23 }
 0x5f0   :  { %v1573_v26 = vmul.f32 %v1566_v0, %v1566_v0  ;;  %v998_v27 = vadd.f32 %v1760_v24, %v993_v1 }
 0x5f2   :  { %1574 = vadd.xlane.f32.xlu1 %v1573_v26  ;;  %v999_v28 = vmul.f32 %v1758_v57, %v998_v27 }
 0x5f4   :  { %v1567_v29 = vmul.f32 %v999_v28, %v999_v28 }
 0x5f6   :  { %1568 = vadd.xlane.f32.xlu0 %v1567_v29 }
 0x61e   :  { %s2076_s21 = spop %2075 }
 0x61f   :  { %v1656_v41 = vstv %s2076_s21 }
 0x67f   :  { %v1575_v33 = vpop.xlane.xlu1 %1574 }
 0x680   :  { %v1576_v34 = vadd.f32 1e-12, %v1575_v33 }
 0x682   :  { %2236 = vrsqrt.f32 %v1576_v34 }
 0x683   :  { %v1569_v35 = vpop.xlane.xlu0 %1568 }
 0x684   :  { %v1570_v36 = vadd.f32 1e-12, %v1569_v35 }
 0x686   :  { %2238 = vrsqrt.f32 %v1570_v36 }
 0x68c   :  { %v2237_v37 = vpop.eup %2236 }
 0x68d   :  { %v1578_v38 = vmul.f32 %v2237_v37, %v1566_v0 }
 0x68f   :  { %2071 = vmatpush3.xpose.msra.mxu0 %v1578_v38  ;;  %1659 = vst [vmem:[%s2491_s6 + $0x8] sm:$0xff] %v1578_v38 }
 0x690   :  { %v2239_v39 = vpop.eup %2238 }
 0x691   :  { %v1572_v40 = vmul.f32 %v2239_v39, %v999_v28 }
 0x693   :  { %2073 = vmatmul.mubr.f32.vlgmr.msra.gmra.mrb[20].mxu0 %v1572_v40  ;;  %1658 = vst [vmem:[%s2491_s6] sm:$0xff] %v1572_v40 }
 0x766   :  { %v1652_v42 = vpop.f32.mrb[20].mxu0 }
 0x767   :  { %v1657_v43 = vmul.f32 %v1656_v41, %v1652_v42  ;;  %v2074_v44 = vpop.f32.mrb[21].mxu0 }
 0x769   :  { %1661 = vst.msk [vmem:[%s2491_s6 + $0x10] sm:$0xff] %vm1098_vm1, %v1657_v43 }
 0x76a   :  { %1666 = vsyncpa [#allocation4], 1 }

</bundles_post_ra>
